<compile_context>
chip_gen: v6e
topology: v6e:2x2x1
jax: 0.10.0
libtpu: 0.0.40
codegen_flags: <defaults>
</compile_context>

<pallas_src>
import numpy as np
import jax
import jax.numpy as jnp
from jax.experimental import pallas as pl
from jax.experimental.pallas import tpu as pltpu


# ---------------------------------------------------------------------------
# Pallas kernel: the whole LMF fusion + fc collapses to
#   fe = e @ EF + ef_bias ;  fn = n @ NF + nf_bias      (EF/NF are (D, R*O))
#   z  = fe * fn                                         (B, R*O)
#   logits = z @ W_fold + b_fold                         (W_fold lane-padded)
# Single invocation, no grid, everything resident in VMEM.
# ---------------------------------------------------------------------------
def lmf_fc_kernel(e_ref, n_ref, ef_mat_ref, ef_bias_ref, nf_mat_ref,
                  nf_bias_ref, w_ref, b_ref, out_ref):
    fe = jnp.dot(e_ref[...], ef_mat_ref[...],
                 preferred_element_type=jnp.float32) + ef_bias_ref[...]   # (B, R*O)
    fn = jnp.dot(n_ref[...], nf_mat_ref[...],
                 preferred_element_type=jnp.float32) + nf_bias_ref[...]   # (B, R*O)
    z = fe * fn                                                           # (B, R*O)
    logits = jnp.dot(z, w_ref[...],
                     preferred_element_type=jnp.float32) + b_ref[...]     # (B, 128)
    out_ref[...] = logits.astype(out_ref.dtype)


def lmf_fc_forward(eeg_feat, nirs_feat, params, *, lane_pad=128):
    """LMF.forward + self.fc, folded into one Pallas kernel invocation."""
    B = eeg_feat.shape[0]
    ef = params["eeg_factor"]                 # (R, De+1, O)
    nf = params["nirs_factor"]                # (R, Dn+1, O)
    fw = params["fusion_weights"]             # (1, R)
    fb = params["fusion_bias"]                # (1, O)
    fcw = params["fc_w"]                      # (2, O)
    fcb = params["fc_b"]                      # (2,)

    R, De1, O = ef.shape
    Dn1 = nf.shape[1]
    RO = R * O
    n_out = fcw.shape[0]                      # 2

    # Factors as (D+1, R*O): the rank reduction becomes part of one matmul.
    ef_flat = jnp.transpose(ef, (1, 0, 2)).reshape(De1, RO)
    nf_flat = jnp.transpose(nf, (1, 0, 2)).reshape(Dn1, RO)
    # Bias-row split: cat(1, x) @ F == F[0] + x @ F[1:]  (no ones-concat copy).
    ef_bias, ef_mat = ef_flat[:1], ef_flat[1:]                            # (1,RO),(De,RO)
    nf_bias, nf_mat = nf_flat[:1], nf_flat[1:]                            # (1,RO),(Dn,RO)

    # Fold fusion_weights / fusion_bias / fc into one weight + bias:
    #   W[r*O+o, c] = fw[r] * fcw[c, o] ;  b = fb @ fcw.T + fcb
    w_fold = (fw.reshape(R, 1, 1) * fcw.T[None, :, :]).reshape(RO, n_out)
    b_fold = fb @ fcw.T + fcb.reshape(1, n_out)

    # Lane-dense output: pad the 2-wide fc into a 128-lane slab (zeros elsewhere).
    w_pad = jnp.zeros((RO, lane_pad), jnp.float32).at[:, :n_out].set(w_fold)
    b_pad = jnp.zeros((1, lane_pad), jnp.float32).at[:, :n_out].set(b_fold)

    # Pad batch to a full sublane group (8) so vreg/MXU rows are better occupied.
    Bp = max(8, -(-B // 8) * 8)
    e_p = jnp.zeros((Bp, De1 - 1), jnp.float32).at[:B].set(eeg_feat)
    n_p = jnp.zeros((Bp, Dn1 - 1), jnp.float32).at[:B].set(nirs_feat)

    flops = (2 * Bp * (De1 - 1) * RO + 2 * Bp * (Dn1 - 1) * RO
             + Bp * RO + 2 * Bp * RO * lane_pad)
    bytes_accessed = 4 * (e_p.size + n_p.size + ef_mat.size + ef_bias.size
                          + nf_mat.size + nf_bias.size + w_pad.size + b_pad.size
                          + Bp * lane_pad)

    vmem_spec = pl.BlockSpec(memory_space=pltpu.MemorySpace.VMEM)
    out = pl.pallas_call(
        lmf_fc_kernel,
        out_shape=jax.ShapeDtypeStruct((Bp, lane_pad), jnp.float32),
        in_specs=[vmem_spec] * 8,
        out_specs=vmem_spec,
        cost_estimate=pl.CostEstimate(flops=flops, transcendentals=0,
                                      bytes_accessed=bytes_accessed),
    )(e_p, n_p, ef_mat, ef_bias, nf_mat, nf_bias, w_pad, b_pad)
    return out[:B, :n_out]


# ---------------------------------------------------------------------------
# EEGNet feature extractors (plain-JAX glue; convs are best left to XLA).
# TODO(synk): EEGNet.EEGNet_eeg / EEGNet_nirs definitions are not in the provided
# source; this follows the canonical EEGNet (Lawhern 2018) feature path
# (BatchNorm in eval mode with default running stats is an identity and is folded out).
# ---------------------------------------------------------------------------
def _conv(x, w, padding, groups=1):
    return jax.lax.conv_general_dilated(
        x, w, window_strides=(1, 1), padding=padding,
        dimension_numbers=("NCHW", "OIHW", "NCHW"),
        feature_group_count=groups)


def _avg_pool_time(x, k):
    s = jax.lax.reduce_window(x, 0.0, jax.lax.add,
                              (1, 1, 1, k), (1, 1, 1, k), "VALID")
    return s / k


def eegnet_features(x, p, F1=8, D=2):
    kw1 = p["conv1_w"].shape[-1]
    h = _conv(x, p["conv1_w"], padding=[(0, 0), ((kw1 - 1) // 2, kw1 // 2)])   # temporal
    h = _conv(h, p["dw_w"], padding="VALID", groups=F1)                        # depthwise spatial
    h = jax.nn.elu(h)
    h = _avg_pool_time(h, 4)
    kw2 = p["sep_dw_w"].shape[-1]
    h = _conv(h, p["sep_dw_w"], padding=[(0, 0), ((kw2 - 1) // 2, kw2 // 2)],
              groups=F1 * D)                                                   # separable (dw)
    h = _conv(h, p["sep_pw_w"], padding="VALID")                               # separable (pw)
    h = jax.nn.elu(h)
    h = _avg_pool_time(h, 8)
    return h.reshape(h.shape[0], -1)                                           # (B, F2 * T//32)


# ---------------------------------------------------------------------------
# Deterministic parameter initialization (shapes per the module's __init__).
# ---------------------------------------------------------------------------
def _xavier_uniform(key, shape, fan_in, fan_out):
    bound = float(np.sqrt(6.0 / (fan_in + fan_out)))
    return jax.random.uniform(key, shape, jnp.float32, -bound, bound)


def init_params(key, eeg_chans, nirs_chans, kern_length, eeg_dim, nirs_dim,
                out_dim, rank, F1=8, D=2, F2=16):
    ks = jax.random.split(key, 14)
    p = {}
    p["eeg"] = {
        "conv1_w":  0.1 * jax.random.normal(ks[0], (F1, 1, 1, kern_length), jnp.float32),
        "dw_w":     0.1 * jax.random.normal(ks[1], (F1 * D, 1, eeg_chans, 1), jnp.float32),
        "sep_dw_w": 0.1 * jax.random.normal(ks[2], (F1 * D, 1, 1, 16), jnp.float32),
        "sep_pw_w": 0.1 * jax.random.normal(ks[3], (F2, F1 * D, 1, 1), jnp.float32),
    }
    p["nirs"] = {
        "conv1_w":  0.1 * jax.random.normal(ks[4], (F1, 1, 1, kern_length), jnp.float32),
        "dw_w":     0.1 * jax.random.normal(ks[5], (F1 * D, 1, nirs_chans, 1), jnp.float32),
        "sep_dw_w": 0.1 * jax.random.normal(ks[6], (F1 * D, 1, 1, 16), jnp.float32),
        "sep_pw_w": 0.1 * jax.random.normal(ks[7], (F2, F1 * D, 1, 1), jnp.float32),
    }
    # LMF parameters (xavier_uniform fans as computed by torch for 3-D tensors).
    p["eeg_factor"] = _xavier_uniform(ks[8], (rank, eeg_dim + 1, out_dim),
                                      fan_in=(eeg_dim + 1) * out_dim,
                                      fan_out=rank * out_dim)
    p["nirs_factor"] = _xavier_uniform(ks[9], (rank, nirs_dim + 1, out_dim),
                                       fan_in=(nirs_dim + 1) * out_dim,
                                       fan_out=rank * out_dim)
    p["fusion_weights"] = _xavier_uniform(ks[10], (1, rank), fan_in=rank, fan_out=1)
    p["fusion_bias"] = jnp.zeros((1, out_dim), jnp.float32)
    # fc = nn.Linear(out_dim, 2)
    bnd = 1.0 / np.sqrt(out_dim)
    p["fc_w"] = jax.random.uniform(ks[11], (2, out_dim), jnp.float32, -bnd, bnd)
    p["fc_b"] = jax.random.uniform(ks[12], (2,), jnp.float32, -bnd, bnd)
    return p


# Pure-JAX reference of the LMF + fc portion (for correctness checking).
def lmf_fc_reference(eeg_feat, nirs_feat, params):
    B = eeg_feat.shape[0]
    ones = jnp.ones((B, 1), jnp.float32)
    e = jnp.concatenate([ones, eeg_feat], axis=1)
    n = jnp.concatenate([ones, nirs_feat], axis=1)
    fe = jnp.einsum("bi,rio->rbo", e, params["eeg_factor"])
    fn = jnp.einsum("bj,rjo->rbo", n, params["nirs_factor"])
    zy = fe * fn
    out = jnp.einsum("kr,rbo->bo", params["fusion_weights"], zy) + params["fusion_bias"]
    return out @ params["fc_w"].T + params["fc_b"]


if __name__ == "__main__":
    key = jax.random.PRNGKey(0)
    B = 2
    eeg_chans, eeg_samples = 8, 64
    nirs_chans, nirs_samples = 4, 64
    kern_length = 7
    F1, D, F2 = 8, 2, 16
    eeg_dim = F2 * (eeg_samples // 32)      # 32
    nirs_dim = F2 * (nirs_samples // 32)    # 32
    out_dim, rank = 16, 4

    k_eeg, k_nirs, k_par = jax.random.split(key, 3)
    eeg = jax.random.normal(k_eeg, (B, 1, eeg_chans, eeg_samples), jnp.float32)
    nirs = jax.random.normal(k_nirs, (B, 1, nirs_chans, nirs_samples), jnp.float32)

    params = init_params(k_par, eeg_chans, nirs_chans, kern_length,
                         eeg_dim, nirs_dim, out_dim, rank, F1, D, F2)

    # Feature extraction (glue, plain JAX).
    e_feat = eegnet_features(eeg, params["eeg"], F1, D)
    n_feat = eegnet_features(nirs, params["nirs"], F1, D)
    assert e_feat.shape == (B, eeg_dim) and n_feat.shape == (B, nirs_dim)

    # LMF fusion + final Linear (single-invocation Pallas kernel).
    out = lmf_fc_forward(e_feat, n_feat, params)
    out = jax.block_until_ready(out)
    assert out.shape == (B, 2)

    ref = lmf_fc_reference(e_feat, n_feat, params)
    np.testing.assert_allclose(np.asarray(out), np.asarray(ref),
                               rtol=1e-4, atol=1e-4)
    print("KERNEL_OK")
</pallas_src>

<mosaic_0001>
module attributes {stable_mosaic.version = 11 : i64} {
  func.func @lmf_fc_kernel(%arg0: memref<8x32xf32, #tpu.memory_space<vmem>>, %arg1: memref<8x32xf32, #tpu.memory_space<vmem>>, %arg2: memref<32x64xf32, #tpu.memory_space<vmem>>, %arg3: memref<1x64xf32, #tpu.memory_space<vmem>>, %arg4: memref<32x64xf32, #tpu.memory_space<vmem>>, %arg5: memref<1x64xf32, #tpu.memory_space<vmem>>, %arg6: memref<64x128xf32, #tpu.memory_space<vmem>>, %arg7: memref<1x128xf32, #tpu.memory_space<vmem>>, %arg8: memref<8x128xf32, #tpu.memory_space<vmem>>) attributes {dimension_semantics = [], scalar_prefetch = 0 : i64, scratch_operands = 0 : i64, tpu.core_type = #tpu.core_type<tc>} {
    %c0 = arith.constant 0 : index
    %c0_0 = arith.constant 0 : index
    %0 = vector.load %arg0[%c0, %c0_0] : memref<8x32xf32, #tpu.memory_space<vmem>>, vector<8x32xf32>
    %c0_1 = arith.constant 0 : index
    %c0_2 = arith.constant 0 : index
    %1 = vector.load %arg2[%c0_1, %c0_2] : memref<32x64xf32, #tpu.memory_space<vmem>>, vector<32x64xf32>
    %cst = arith.constant dense<0.000000e+00> : vector<8x64xf32>
    %2 = tpu.matmul %0, %1, %cst {dimension_numbers = #tpu.dot_dimension_numbers<[1], [0], [0], [1], [0, 0, 1, 1], [], []>} : vector<8x32xf32>, vector<32x64xf32>, vector<8x64xf32> -> vector<8x64xf32>
    %c0_3 = arith.constant 0 : index
    %c0_4 = arith.constant 0 : index
    %3 = vector.load %arg3[%c0_3, %c0_4] : memref<1x64xf32, #tpu.memory_space<vmem>>, vector<1x64xf32>
    %4 = vector.broadcast %3 : vector<1x64xf32> to vector<8x64xf32>
    %5 = arith.addf %2, %4 : vector<8x64xf32>
    %c0_5 = arith.constant 0 : index
    %c0_6 = arith.constant 0 : index
    %6 = vector.load %arg1[%c0_5, %c0_6] : memref<8x32xf32, #tpu.memory_space<vmem>>, vector<8x32xf32>
    %c0_7 = arith.constant 0 : index
    %c0_8 = arith.constant 0 : index
    %7 = vector.load %arg4[%c0_7, %c0_8] : memref<32x64xf32, #tpu.memory_space<vmem>>, vector<32x64xf32>
    %cst_9 = arith.constant dense<0.000000e+00> : vector<8x64xf32>
    %8 = tpu.matmul %6, %7, %cst_9 {dimension_numbers = #tpu.dot_dimension_numbers<[1], [0], [0], [1], [0, 0, 1, 1], [], []>} : vector<8x32xf32>, vector<32x64xf32>, vector<8x64xf32> -> vector<8x64xf32>
    %c0_10 = arith.constant 0 : index
    %c0_11 = arith.constant 0 : index
    %9 = vector.load %arg5[%c0_10, %c0_11] : memref<1x64xf32, #tpu.memory_space<vmem>>, vector<1x64xf32>
    %10 = vector.broadcast %9 : vector<1x64xf32> to vector<8x64xf32>
    %11 = arith.addf %8, %10 : vector<8x64xf32>
    %12 = arith.mulf %5, %11 : vector<8x64xf32>
    %c0_12 = arith.constant 0 : index
    %c0_13 = arith.constant 0 : index
    %13 = vector.load %arg6[%c0_12, %c0_13] : memref<64x128xf32, #tpu.memory_space<vmem>>, vector<64x128xf32>
    %cst_14 = arith.constant dense<0.000000e+00> : vector<8x128xf32>
    %14 = tpu.matmul %12, %13, %cst_14 {dimension_numbers = #tpu.dot_dimension_numbers<[1], [0], [0], [1], [0, 0, 1, 1], [], []>} : vector<8x64xf32>, vector<64x128xf32>, vector<8x128xf32> -> vector<8x128xf32>
    %c0_15 = arith.constant 0 : index
    %c0_16 = arith.constant 0 : index
    %15 = vector.load %arg7[%c0_15, %c0_16] : memref<1x128xf32, #tpu.memory_space<vmem>>, vector<1x128xf32>
    %16 = vector.broadcast %15 : vector<1x128xf32> to vector<8x128xf32>
    %17 = arith.addf %14, %16 : vector<8x128xf32>
    %c0_17 = arith.constant 0 : index
    %c0_18 = arith.constant 0 : index
    %18 = vector.load %arg8[%c0_17, %c0_18] : memref<8x128xf32, #tpu.memory_space<vmem>>, vector<8x128xf32>
    tpu.vector_store %arg8[%c0_17, %c0_18], %17 {strides = array<i32>} : memref<8x128xf32, #tpu.memory_space<vmem>>, vector<8x128xf32>,
    return
  }
}

</mosaic_0001>

<bundles_post_ra>
// kernel: tpu_custom_call.1
= control target key start
LH: loop header
LB: loop body
LE: loop exit
PB: predicated region body
PF: predicated region fallthrough
CT: control target
= control target key end

     0   :  { %13 = vsyncpa [#allocation3], 0  ;;  %s673_s0 = inlined_call_operand.hbm [shape: f32[8,32], index: 0, kind: input, shape index: {}]   ;;  %s674_s1 = inlined_call_operand.hbm [shape: f32[8,32], index: 1, kind: input, shape index: {}]   ;;  %s675_s2 = inlined_call_operand.hbm [shape: f32[32,64], index: 2, kind: input, shape index: {}]   ;;  %s676_s3 = inlined_call_operand.vmem [shape: f32[1,64], index: 3, kind: input, shape index: {}]   ;;  %s677_s4 = inlined_call_operand.hbm [shape: f32[32,64], index: 4, kind: input, shape index: {}]   ;;  %s678_s5 = inlined_call_operand.vmem [shape: f32[1,64], index: 5, kind: input, shape index: {}]   ;;  %s679_s6 = inlined_call_operand.hbm [shape: f32[64,128], index: 6, kind: input, shape index: {}]   ;;  %s680_s7 = inlined_call_operand.vmem [shape: f32[1,128], index: 7, kind: input, shape index: {}]   ;;  %s681_s8 = inlined_call_operand.hbm [shape: f32[8,128], index: 8, kind: output, shape index: {}]  }
   0x1   :  { %14 = vsyncpa [#allocation6], 0 }
   0x2   :  { %15 = vsyncpa [#allocation9], 0 }
   0x3   :  { %16 = vsyncpa [#allocation4], 0  ;;  %s577_s27 = smov [#allocation5]  }
   0x4   :  { %s33_s28 = sshll.u32 %s577_s27, 4  ;;  %s34_s28 = int_to_ptr.vmem [resolvable:$true] %s33_s28 }
   0x5   :  { %s457_s29 = scalar_lea.vmem %s34_s28, 128  ;;  %p462_p1 = scmp.lt.s32.totalorder %s34_s28, %s34_s28 }
   0x6   :  { %p458_p0 = scmp.ne.s32.totalorder %s34_s28, %s457_s29  ;;  %p463_p2 = scmp.lt.s32.totalorder %s457_s29, %s457_s29 }
   0x8   :  { %p464_p3 = por %p463_p2, %p462_p1 }
   0xa   :  { %p465_p4 = pnand %p464_p3, %p458_p0 }
   0xc   :  { %468 = shalt.err (!%p465_p4)
}
   0xd   :  { %36 = dma.hbm_to_vmem [thread:$0]  %s674_s1, 128, %s34_s28, [#allocation6]  }
   0xe   :  { %s578_s10 = smov [#allocation8]   ;;  %s579_s12 = smov [#allocation2]  }
   0xf   :  { %s56_s11 = sshll.u32 %s578_s10, 4  ;;  %s23_s13 = sshll.u32 %s579_s12, 4  ;;  %s57_s11 = int_to_ptr.vmem [resolvable:$true] %s56_s11  ;;  %s24_s13 = int_to_ptr.vmem [resolvable:$true] %s23_s13 }
  0x10   :  { %s477_s14 = scalar_lea.vmem %s57_s11, 512  ;;  %p482_p6 = scmp.lt.s32.totalorder %s57_s11, %s57_s11 }
  0x11   :  { %p478_p5 = scmp.ne.s32.totalorder %s57_s11, %s477_s14  ;;  %p483_p7 = scmp.lt.s32.totalorder %s477_s14, %s477_s14 }
  0x13   :  { %p484_p8 = por %p483_p7, %p482_p6 }
  0x15   :  { %p485_p9 = pnand %p484_p8, %p478_p5 }
  0x17   :  { %488 = shalt.err (!%p485_p9)
}
  0x18   :  { %s580_s15 = smov 128   ;;  %s581_s16 = smov 8  }
  0x19   :  { %62 = dma.hbm_to_vmem [thread:$0]  %s677_s4, 512, %s57_s11, [#allocation9], %s580_s15, %s580_s15, %s581_s16  }
  0x1a   :  { %s497_s1 = scalar_lea.vmem %s24_s13, 128  ;;  %p502_p11 = scmp.lt.s32.totalorder %s24_s13, %s24_s13 }
  0x1b   :  { %p498_p10 = scmp.ne.s32.totalorder %s24_s13, %s497_s1  ;;  %p503_p12 = scmp.lt.s32.totalorder %s497_s1, %s497_s1 }
  0x1d   :  { %p504_p13 = por %p503_p12, %p502_p11 }
  0x1f   :  { %p505_p0 = pnand %p504_p13, %p498_p10 }
  0x21   :  { %508 = shalt.err (!%p505_p0)
}
  0x22   :  { %26 = dma.hbm_to_vmem [thread:$0]  %s673_s0, 128, %s24_s13, [#allocation3]  }
  0x23   :  { %s582_s21 = smov [#allocation7]   ;;  %s583_s23 = smov [#allocation10]  }
  0x24   :  { %s42_s22 = sshll.u32 %s582_s21, 4  ;;  %s70_s24 = sshll.u32 %s583_s23, 4  ;;  %s43_s22 = int_to_ptr.vmem [resolvable:$true] %s42_s22  ;;  %s71_s24 = int_to_ptr.vmem [resolvable:$true] %s70_s24 }
  0x25   :  { %s517_s25 = scalar_lea.vmem %s43_s22, 512  ;;  %p522_p2 = scmp.lt.s32.totalorder %s43_s22, %s43_s22 }
  0x26   :  { %p518_p1 = scmp.ne.s32.totalorder %s43_s22, %s517_s25  ;;  %p523_p3 = scmp.lt.s32.totalorder %s517_s25, %s517_s25 }
  0x28   :  { %p524_p4 = por %p523_p3, %p522_p2 }
  0x2a   :  { %p525_p5 = pnand %p524_p4, %p518_p1 }
  0x2c   :  { %528 = shalt.err (!%p525_p5)
}
  0x2d   :  { %48 = dma.hbm_to_vmem [thread:$0]  %s675_s2, 512, %s43_s22, [#allocation6], %s580_s15, %s580_s15, %s581_s16  }
  0x2e   :  { %s537_s0 = scalar_lea.vmem %s71_s24, 1024  ;;  %p542_p7 = scmp.lt.s32.totalorder %s71_s24, %s71_s24 }
  0x2f   :  { %p538_p6 = scmp.ne.s32.totalorder %s71_s24, %s537_s0  ;;  %p543_p8 = scmp.lt.s32.totalorder %s537_s0, %s537_s0 }
  0x31   :  { %p544_p9 = por %p543_p8, %p542_p7 }
  0x33   :  { %p545_p10 = pnand %p544_p9, %p538_p6 }
  0x35   :  { %548 = shalt.err (!%p545_p10)
}
  0x36   :  { %76 = dma.hbm_to_vmem [thread:$0]  %s679_s6, 1024, %s71_s24, [#allocation9], %s580_s15, %s580_s15, %s581_s16  }
  0x37   :  { %569 = dma.done.wait [#allocation3], 128  }
  0x38   :  { %570 = vsyncadd [#allocation3], 4294967168 }
  0x39   :  { %571 = dma.done.wait [#allocation6], 640  }
  0x3a   :  { %572 = vsyncadd [#allocation6], 4294966656 }
  0x3b   :  { %573 = dma.done.wait [#allocation9], 1536  }
  0x3c   :  { %574 = vsyncadd [#allocation9], 4294965760  ;;  %v584_v0 = vmov 0.0   ;;  %vm585_vm0 = vmmov 0   ;;  %v98_v1 = vld [vmem:[#allocation7 + $0x18] sm:$0xff]  ;;  %v97_v2 = vld [vmem:[#allocation7 + $0x10] sm:$0xff] }
  0x3d   :  { %398 = vmatprep.subr.mxu1 %v584_v0  ;;  %406 = vmatprep.mubr.msk.f32.mxu1 %vm585_vm0, %v584_v0  ;;  %v96_v3 = vld [vmem:[#allocation7 + $0x8] sm:$0xff]  ;;  %v273_v4 = vld [vmem:[#allocation10 + $0x38] sm:$0xff]  ;;  %v95_v5 = vld [vmem:[#allocation7] sm:$0xff]  ;;  %vm106_vm1 = vcmask 261120   ;;  %vm281_vm2 = vcmask 523264   ;;  %s586_s11 = smov [#allocation11]  }
  0x3e   :  { %420 = vmatprep.subr.mxu0 %v584_v0  ;;  %436 = vmatprep.mubr.msk.f32.mxu0 %vm585_vm0, %v584_v0  ;;  %v94_v6 = vld [vmem:[#allocation2] sm:$0xff]  ;;  %v184_v7 = vld [vmem:[#allocation8 + $0x18] sm:$0xff]  ;;  %v182_v9 = vld [vmem:[#allocation8 + $0x8] sm:$0xff]  ;;  %s362_s12 = sshll.u32 %s586_s11, 4  ;;  %s363_s12 = int_to_ptr.vmem [resolvable:$true] %s362_s12 }
  0x3f   :  { %399 = vmatpush3.msra.mxu1 %v98_v1  ;;  %421 = vmatpush3.msra.mxu0 %v273_v4  ;;  %v183_v8 = vld [vmem:[#allocation8 + $0x10] sm:$0xff]  ;;  %v181_v10 = vld [vmem:[#allocation8] sm:$0xff]  ;;  %v180_v11 = vld [vmem:[#allocation5] sm:$0xff]  ;;  %p554_p12 = scmp.lt.s32.totalorder %s363_s12, %s363_s12 }
  0x40   :  { %400 = vmatprep.subr.mxu1 %v584_v0  ;;  %422 = vmatprep.subr.mxu0 %v584_v0  ;;  %v272_v12 = vld [vmem:[#allocation10 + $0x30] sm:$0xff]  ;;  %v271_v13 = vld [vmem:[#allocation10 + $0x28] sm:$0xff]  ;;  %v270_v14 = vld [vmem:[#allocation10 + $0x20] sm:$0xff] }
  0x41   :  { %401 = vmatpush3.msra.mxu1 %v97_v2  ;;  %423 = vmatpush3.msra.mxu0 %v272_v12  ;;  %v269_v15 = vld [vmem:[#allocation10 + $0x18] sm:$0xff]  ;;  %v268_v16 = vld [vmem:[#allocation10 + $0x10] sm:$0xff]  ;;  %v267_v17 = vld [vmem:[#allocation10 + $0x8] sm:$0xff] }
  0x42   :  { %402 = vmatprep.subr.mxu1 %v584_v0  ;;  %424 = vmatprep.subr.mxu0 %v584_v0  ;;  %v266_v18 = vld [vmem:[#allocation10] sm:$0xff]  ;;  %v373_v21 = vld [vmem:[%s676_s3] ss:$0 sm:$0xff]  ;;  %s549_s3 = scalar_lea.vmem %s363_s12, 128 }
  0x43   :  { %403 = vmatpush3.msra.mxu1 %v96_v3  ;;  %425 = vmatpush3.msra.mxu0 %v271_v13  ;;  %v375_v22 = vld [vmem:[%s678_s5] ss:$0 sm:$0xff]  ;;  %p550_p11 = scmp.ne.s32.totalorder %s363_s12, %s549_s3  ;;  %p555_p13 = scmp.lt.s32.totalorder %s549_s3, %s549_s3 }
  0x44   :  { %404 = vmatprep.subr.mxu1 %v584_v0  ;;  %426 = vmatprep.subr.mxu0 %v584_v0  ;;  %v377_v28 = vld [vmem:[%s680_s7] ss:$0 sm:$0xff] }
  0x45   :  { %405 = vmatpush3.msra.mxu1 %v95_v5  ;;  %427 = vmatpush3.msra.mxu0 %v270_v14  ;;  %p556_p0 = por %p555_p13, %p554_p12 }
  0x46   :  { %407 = vmatmul.mubr.msk.f32.vlgmr.msra.gmra.mxu1 %vm106_vm1, %v94_v6  ;;  %409 = vmatprep.subr.mxu1 %v584_v0 }
  0x47   :  { %410 = vmatpush3.msra.mxu1 %v184_v7  ;;  %417 = vmatprep.mubr.msk.f32.mxu1 %vm585_vm0, %v584_v0  ;;  %p557_p1 = pnand %p556_p0, %p550_p11 }
  0x48   :  { %411 = vmatprep.subr.mxu1 %v584_v0  ;;  %428 = vmatprep.subr.mxu0 %v584_v0 }
  0x49   :  { %412 = vmatpush3.msra.mxu1 %v183_v8  ;;  %429 = vmatpush3.msra.mxu0 %v269_v15 }
  0x4a   :  { %413 = vmatprep.subr.mxu1 %v584_v0  ;;  %430 = vmatprep.subr.mxu0 %v584_v0 }
  0x4b   :  { %414 = vmatpush3.msra.mxu1 %v182_v9  ;;  %431 = vmatpush3.msra.mxu0 %v268_v16 }
  0x4c   :  { %415 = vmatprep.subr.mxu1 %v584_v0  ;;  %432 = vmatprep.subr.mxu0 %v584_v0 }
  0x4d   :  { %416 = vmatpush3.msra.mxu1 %v181_v10  ;;  %433 = vmatpush3.msra.mxu0 %v267_v17 }
  0x4e   :  { %418 = vmatmul.mubr.msk.f32.vlgmr.msra.gmra.mxu1 %vm106_vm1, %v180_v11  ;;  %434 = vmatprep.subr.mxu0 %v584_v0 }
  0x4f   :  { %435 = vmatpush3.msra.mxu0 %v266_v18 }
 0x106   :  { %v176_v19 = vpop.f32.mrf.mxu1 }
 0x107   :  { %v177_v24 = vadd.f32 %v373_v21, %v176_v19 }
 0x108   :  { %v408_v20 = vpop.f32.mrf.mxu1 }
 0x10e   :  { %v261_v23 = vpop.f32.mrf.mxu1 }
 0x10f   :  { %v262_v25 = vadd.f32 %v375_v22, %v261_v23 }
 0x110   :  { %v419_v26 = vpop.f32.mrf.mxu1 }
 0x111   :  { %v265_v27 = vmul.f32 %v262_v25, %v177_v24 }
 0x113   :  { %437 = vmatmul.mubr.msk.f32.vlgmr.msra.gmra.mxu0 %vm281_vm2, %v265_v27 }
 0x1d3   :  { %v351_v29 = vpop.f32.mrf.mxu0 }
 0x1d4   :  { %v352_v30 = vadd.f32 %v377_v28, %v351_v29 }
 0x1d5   :  { %v438_v31 = vpop.f32.mrf.mxu0 }
 0x1d6   :  { %355 = vst [vmem:[#allocation11] sm:$0xff] %v352_v30 }
 0x1d7   :  { %560 = shalt.err (!%p557_p1)
}
 0x1d8   :  { %365 = dma.vmem_to_hbm [thread:$0]  %s363_s12, 128, %s681_s8, [#allocation4]  }
 0x1d9   :  { %575 = dma.done.wait [#allocation4], 128  }
 0x1da   :  { %576 = vsyncadd [#allocation4], 4294967168 }
 0x1db   :  { %369 = vsyncpa [#allocation3], 1 }
 0x1dc   :  { %370 = vsyncpa [#allocation6], 1 }
 0x1dd   :  { %371 = vsyncpa [#allocation9], 1 }
 0x1de   :  { %372 = vsyncpa [#allocation4], 1 }

</bundles_post_ra>
